<compile_context>
chip_gen: v7x
topology: tpu7x:2x2x1
jax: 0.10.0
libtpu: 0.0.40
codegen_flags: <defaults>
</compile_context>

<pallas_src>
import functools
from math import sqrt

import jax
import jax.numpy as jnp
from jax.experimental import pallas as pl
from jax.experimental.pallas import tpu as pltpu


# --------------------------------------------------------------------------
# Exact (erf-based) GELU matching torch.nn.GELU() default.  erf uses the
# Abramowitz & Stegun 7.1.26 polynomial (|err| < 1.5e-7) built from ops that
# always lower on TPU (exp -> EUP slot, one divide).
# --------------------------------------------------------------------------
def _erf_approx(v):
    a1, a2, a3, a4, a5 = 0.254829592, -0.284496736, 1.421413741, -1.453152027, 1.061405429
    p = 0.3275911
    av = jnp.abs(v)
    t = 1.0 / (1.0 + p * av)
    poly = ((((a5 * t + a4) * t + a3) * t + a2) * t + a1) * t
    e = 1.0 - poly * jnp.exp(-av * av)
    return jnp.where(v >= 0, e, -e)


def _gelu_exact(v):
    return 0.5 * v * (1.0 + _erf_approx(v * 0.7071067811865476))


# --------------------------------------------------------------------------
# One-time probe for pltpu.roll's shift direction (jnp.roll convention vs the
# opposite), so the causal lane shifts below are correct on any backend.
# --------------------------------------------------------------------------
def _roll_probe_kernel(x_ref, o_ref):
    o_ref[...] = pltpu.roll(x_ref[...], shift=1, axis=1)


@functools.lru_cache(maxsize=None)
def _roll_matches_jnp_roll():
    x = jnp.broadcast_to(jnp.arange(128, dtype=jnp.float32)[None, :], (8, 128))
    y = pl.pallas_call(
        _roll_probe_kernel,
        out_shape=jax.ShapeDtypeStruct((8, 128), jnp.float32),
    )(x)
    # jnp.roll convention: out[t] = in[t - 1]  ->  out[0, 1] == 0.0
    return bool(jax.device_get(y)[0, 1] == 0.0)


# --------------------------------------------------------------------------
# Pallas kernel: one batch-block (Bt batch elements, rows flattened) per step.
# --------------------------------------------------------------------------
def multires_scale_kernel(x_ref, prm_ref, wblk_ref, b_ref, up_ref, o_ref, *,
                          depth, ksize, roll_right):
    low = x_ref[...]                                   # (Rt, L) f32, Rt = Bt*C
    rt, L = low.shape
    lane = jax.lax.broadcasted_iota(jnp.int32, (rt, L), 1)   # hoisted once

    def shift_causal(v, s):
        # out[:, t] = v[:, t - s] for t >= s, else 0  (causal history is zero).
        if s <= 0:
            return v
        if s >= L:
            return jnp.zeros_like(v)
        amount = s if roll_right else L - s
        rolled = pltpu.roll(v, shift=amount, axis=1)   # XLU lane rotation
        return jnp.where(lane >= s, rolled, 0.0)

    # Packed per-row parameters: [h0 | h1 | w], loaded once.
    prm = prm_ref[...]                                 # (Rt, 2*ksize + depth + 2)
    h0 = prm[:, 0:ksize]
    h1 = prm[:, ksize:2 * ksize]
    w = prm[:, 2 * ksize:]

    w0 = w[:, 0:1]
    y = low * w[:, depth + 1:depth + 2]                # x * w[:, -1]
    dil = 1
    for i in range(depth, 0, -1):
        # Shifted taps shared between the h1 (high) and h0 (low) filters.
        taps = [low] + [shift_causal(low, dil * j) for j in range(1, ksize)]
        wi = w[:, i:i + 1]
        # y += w_i * (h1 depthwise-conv low): fold w_i into the (Rt,1)
        # coefficients so no full-width "high" accumulator is formed.
        for j in range(ksize):
            y = y + (wi * h1[:, ksize - 1 - j:ksize - j]) * taps[j]
        if i == 1:
            # Final residual_low only feeds "y += w0 * low": fold w0 too.
            for j in range(ksize):
                y = y + (w0 * h0[:, ksize - 1 - j:ksize - j]) * taps[j]
        else:
            new_low = h0[:, ksize - 1:ksize] * taps[0]
            for j in range(1, ksize):
                new_low = new_low + h0[:, ksize - 1 - j:ksize - j] * taps[j]
            low = new_low
        dil *= 2
    if depth == 0:                                     # degenerate config
        y = y + w0 * low

    a = _gelu_exact(y)                                 # multires activation (dropout p=0)

    # 1x1 Conv1d over the whole batch block as one block-diagonal MXU matmul.
    z = jnp.dot(wblk_ref[...], a, preferred_element_type=jnp.float32) + b_ref[...]
    g = _gelu_exact(z)

    # Fused nearest-neighbour upsample: 0/1 interleave matmul on the MXU
    # -> lane-dense (Rt_out, scale*L) output written directly.
    o_ref[...] = jnp.dot(g, up_ref[...], preferred_element_type=jnp.float32)


# --------------------------------------------------------------------------
# Wrapper
# --------------------------------------------------------------------------
def _pick_bt(B, C, C_out, L, itemsize=4, budget_bytes=2 << 20):
    """Largest Bt dividing B whose (Bt*C, L) input tile stays under ~2 MiB and
    keeps the block sublane-aligned (multiples of 8) unless it covers B."""
    best = None
    for cand in range(1, B + 1):
        if B % cand:
            continue
        if cand != B and ((cand * C) % 8 != 0 or (cand * C_out) % 8 != 0):
            continue
        if cand * C * L * itemsize > budget_bytes:
            continue
        best = cand
    return best if best is not None else B


def multires_scale_block(x, h0, h1, w, wc, bias, *, depth=6, ksize=3,
                         scale_factor=2, bt=None):
    B, C, L = x.shape
    C_out = wc.shape[0]
    if bt is None:
        bt = _pick_bt(B, C, C_out, L)
    assert B % bt == 0, (B, bt)
    rt_in, rt_out = bt * C, bt * C_out

    # Flatten (B, C) onto the sublane axis; pack + tile the per-channel params
    # so one small (Bt*C, .) block serves every grid step (fetched once).
    x2 = x.reshape(B * C, L)
    prm = jnp.tile(jnp.concatenate([h0, h1, w], axis=1), (bt, 1))  # (Bt*C, 2K+D+2)
    wblk = jnp.kron(jnp.eye(bt, dtype=wc.dtype), wc)   # (Bt*C_out, Bt*C) block-diag
    biast = jnp.tile(bias.reshape(C_out, 1), (bt, 1))  # (Bt*C_out, 1)
    # Nearest-neighbour upsample as a constant 0/1 interleave matrix.
    up = (jnp.arange(scale_factor * L)[None, :] // scale_factor
          == jnp.arange(L)[:, None]).astype(x.dtype)   # (L, scale*L)
    # TODO(synk): for very long L this keeps the whole sequence in one block
    # (the causal stack needs 2^depth*(ksize-1) lanes of history to tile time).

    kern = functools.partial(multires_scale_kernel, depth=depth, ksize=ksize,
                             roll_right=_roll_matches_jnp_roll())
    pcols = 2 * ksize + depth + 2

    out2 = pl.pallas_call(
        kern,
        out_shape=jax.ShapeDtypeStruct((B * C_out, scale_factor * L), jnp.float32),
        grid=(B // bt,),
        in_specs=[
            pl.BlockSpec((rt_in, L), lambda i: (i, 0)),             # x rows
            pl.BlockSpec((rt_in, pcols), lambda i: (0, 0)),         # packed h0|h1|w
            pl.BlockSpec((rt_out, rt_in), lambda i: (0, 0)),        # block-diag 1x1 conv
            pl.BlockSpec((rt_out, 1), lambda i: (0, 0)),            # bias (tiled)
            pl.BlockSpec((L, scale_factor * L), lambda i: (0, 0)),  # upsample matrix
        ],
        out_specs=pl.BlockSpec((rt_out, scale_factor * L), lambda i: (i, 0)),
        compiler_params=pltpu.CompilerParams(dimension_semantics=("parallel",)),
    )(x2, prm, wblk, biast, up)

    return out2.reshape(B, C_out, scale_factor * L)


# --------------------------------------------------------------------------
# Pure-JAX reference (mirrors the PyTorch forward order exactly).
# --------------------------------------------------------------------------
def ref_forward(x, h0, h1, w, wc, bias, depth, ksize, scale_factor):
    B, C, L = x.shape

    def causal_dconv(v, h, dil):
        pad = dil * (ksize - 1)
        vp = jnp.pad(v, ((0, 0), (0, 0), (pad, 0)))
        out = jnp.zeros_like(v)
        for k in range(ksize):
            out = out + h[None, :, k, None] * vp[:, :, dil * k: dil * k + L]
        return out

    low = x
    y = jnp.zeros_like(x)
    dil = 1
    for i in range(depth, 0, -1):
        high = causal_dconv(low, h1, dil)
        low = causal_dconv(low, h0, dil)
        y = y + w[None, :, i, None] * high
        dil *= 2
    y = y + w[None, :, 0, None] * low
    y = y + x * w[None, :, -1, None]
    y = jax.nn.gelu(y, approximate=False)              # multires activation
    y = jnp.repeat(y, scale_factor, axis=-1)           # nearest-neighbour upsample
    z = jnp.einsum("oc,bcl->bol", wc, y,
                   precision=jax.lax.Precision.HIGHEST) + bias[None, :, None]
    return jax.nn.gelu(z, approximate=False)


if __name__ == "__main__":
    B, C_in, C_out, L = 2, 4, 8, 128
    ksize, depth, scale = 3, 6, 2

    key = jax.random.PRNGKey(0)
    kx, k1, k2, k3, k4, k5 = jax.random.split(key, 6)

    # Parameter shapes / init scales from the module's __init__ (h0/h1 keep the
    # (C, K) view of torch's (C, 1, K) depthwise filters).
    scalar = sqrt(2.0) / (ksize * 2)
    h0 = jax.random.uniform(k1, (C_in, ksize), jnp.float32, -1.0, 1.0) * scalar
    h1 = jax.random.uniform(k2, (C_in, ksize), jnp.float32, -1.0, 1.0) * scalar
    w = jax.random.uniform(k3, (C_in, depth + 2), jnp.float32, -1.0, 1.0) * sqrt(2.0 / (2 * depth + 4))
    bound = 1.0 / sqrt(C_in)
    wc = jax.random.uniform(k4, (C_out, C_in), jnp.float32, -bound, bound)   # Conv1d(C_in->C_out, 1).weight
    bias = jax.random.uniform(k5, (C_out,), jnp.float32, -bound, bound)      # Conv1d bias

    x = jax.random.normal(kx, (B, C_in, L), jnp.float32)

    out = jax.block_until_ready(
        multires_scale_block(x, h0, h1, w, wc, bias,
                             depth=depth, ksize=ksize, scale_factor=scale))
    assert out.shape == (B, C_out, L * scale), out.shape

    ref = ref_forward(x, h0, h1, w, wc, bias, depth, ksize, scale)
    err = float(jnp.max(jnp.abs(out - ref)))
    assert err < 2e-4, f"max abs error {err}"

    print("KERNEL_OK")
</pallas_src>

<mosaic_0001>
module attributes {stable_mosaic.version = 11 : i64} {
  func.func @_roll_probe_kernel(%arg0: memref<8x128xf32, #tpu.memory_space<vmem>>, %arg1: memref<8x128xf32, #tpu.memory_space<vmem>>) attributes {dimension_semantics = [], scalar_prefetch = 0 : i64, scratch_operands = 0 : i64, tpu.core_type = #tpu.core_type<tc>} {
    %c0 = arith.constant 0 : index
    %c0_0 = arith.constant 0 : index
    %0 = vector.load %arg0[%c0, %c0_0] : memref<8x128xf32, #tpu.memory_space<vmem>>, vector<8x128xf32>
    %c1_i32 = arith.constant 1 : i32
    %1 = tpu.dynamic_rotate %0 by %c1_i32 dim 1 : vector<8x128xf32>, i32 -> vector<8x128xf32>
    %c0_1 = arith.constant 0 : index
    %c0_2 = arith.constant 0 : index
    %2 = vector.load %arg1[%c0_1, %c0_2] : memref<8x128xf32, #tpu.memory_space<vmem>>, vector<8x128xf32>
    tpu.vector_store %arg1[%c0_1, %c0_2], %1 {strides = array<i32>} : memref<8x128xf32, #tpu.memory_space<vmem>>, vector<8x128xf32>,
    return
  }
}

</mosaic_0001>

<bundles_post_ra>
// kernel: tpu_custom_call.1
= control target key start
LH: loop header
LB: loop body
LE: loop exit
PB: predicated region body
PF: predicated region fallthrough
CT: control target
= control target key end

     0   :  { %6 = vsyncpa [#allocation3], 0  ;;  %s128_s0 = inlined_call_operand.hbm [shape: f32[8,128], index: 0, kind: input, shape index: {}]   ;;  %s129_s1 = inlined_call_operand.hbm [shape: f32[8,128], index: 1, kind: output, shape index: {}]  }
   0x1   :  { %7 = vsyncpa [#allocation4], 0  ;;  %s91_s6 = smov [#allocation2]   ;;  %s43_s10 = scalar_lea.hbm %s128_s0, 128 }
   0x2   :  { %s14_s7 = sshll.u32 %s91_s6, 4  ;;  %p44_p0 = scmp.ne.s32.totalorder %s128_s0, %s43_s10  ;;  %s15_s7 = int_to_ptr.vmem [resolvable:$true] %s14_s7 }
   0x3   :  { %p47_p1 = scmp.lt.u32.totalorder %s43_s10, %s128_s0 }
   0x5   :  { %p49_p2 = pnand %p47_p1, %p44_p0 }
   0x7   :  { %52 = shalt.err (!%p49_p2)
}
   0x8   :  { %s53_s15 = scalar_lea.vmem %s15_s7, 128  ;;  %p58_p4 = scmp.lt.s32.totalorder %s15_s7, %s15_s7 }
   0x9   :  { %p54_p3 = scmp.ne.s32.totalorder %s15_s7, %s53_s15  ;;  %p59_p5 = scmp.lt.s32.totalorder %s53_s15, %s53_s15 }
   0xb   :  { %p60_p6 = por %p59_p5, %p58_p4 }
   0xd   :  { %p61_p7 = pnand %p60_p6, %p54_p3 }
   0xf   :  { %64 = shalt.err (!%p61_p7)
}
  0x10   :  { %17 = dma.hbm_to_vmem [thread:$0]  %s128_s0, 128, %s15_s7, [#allocation3]  }
  0x11   :  { %87 = dma.done.wait [#allocation3], 128  }
  0x12   :  { %88 = vsyncadd [#allocation3], 4294967168  ;;  %v21_v0 = vld [vmem:[#allocation2] sm:$0xff]  ;;  %s92_s18 = smov 1   ;;  %s93_s19 = smov [#allocation5]  }
  0x13   :  { %22 = vrot.lane.b32.xlu0 %v21_v0, %s92_s18  ;;  %s31_s20 = sshll.u32 %s93_s19, 4  ;;  %s32_s20 = int_to_ptr.vmem [resolvable:$true] %s31_s20 }
  0x14   :  { %s65_s21 = scalar_lea.vmem %s32_s20, 128  ;;  %p70_p9 = scmp.lt.s32.totalorder %s32_s20, %s32_s20 }
  0x15   :  { %p66_p8 = scmp.ne.s32.totalorder %s32_s20, %s65_s21  ;;  %p71_p10 = scmp.lt.s32.totalorder %s65_s21, %s65_s21 }
  0x17   :  { %p72_p11 = por %p71_p10, %p70_p9 }
  0x19   :  { %p73_p12 = pnand %p72_p11, %p66_p8 }
  0x85   :  { %v23_v1 = vpop.permute.xlu0 %22 }
  0x86   :  { %24 = vst [vmem:[#allocation5] sm:$0xff] %v23_v1 }
  0x87   :  { %76 = shalt.err (!%p73_p12)
}
  0x88   :  { %s77_s0 = scalar_lea.hbm %s129_s1, 128 }
  0x89   :  { %p78_p13 = scmp.ne.s32.totalorder %s129_s1, %s77_s0  ;;  %p81_p0 = scmp.lt.u32.totalorder %s77_s0, %s129_s1 }
  0x8b   :  { %p83_p1 = pnand %p81_p0, %p78_p13 }
  0x8d   :  { %86 = shalt.err (!%p83_p1)
}
  0x8e   :  { %34 = dma.vmem_to_hbm [thread:$0]  %s32_s20, 128, %s129_s1, [#allocation4]  }
  0x8f   :  { %89 = dma.done.wait [#allocation4], 128  }
  0x90   :  { %90 = vsyncadd [#allocation4], 4294967168 }
  0x91   :  { %38 = vsyncpa [#allocation3], 1 }
  0x92   :  { %39 = vsyncpa [#allocation4], 1 }

</bundles_post_ra>
